<compile_context>
chip_gen: v7x
topology: tpu7x:2x2x1
jax: 0.10.0
libtpu: 0.0.40
codegen_flags: <defaults>
</compile_context>

<pallas_src>
import functools

import numpy as np
import jax
import jax.numpy as jnp
from jax.experimental import pallas as pl
from jax.experimental.pallas import tpu as pltpu


def _res2net_kernel(x_ref, w_ref, bias_ref, gamma_ref, beta_ref, o_ref,
                    yprev_ref, zpad_ref, zstk_ref, *,
                    kernel_size, dilation, pad, eps):
    """One grid step == one channel chunk (scale group)."""
    B, Cc, T = x_ref.shape
    K = kernel_size
    d = dilation
    i = pl.program_id(0)

    @pl.when(i == 0)
    def _():
        # Chunk 0 is the identity path.  Also zero the carried state so group 1
        # (which has no residual input) can add it unconditionally.
        o_ref[...] = x_ref[...]
        yprev_ref[...] = jnp.zeros_like(yprev_ref)

    @pl.when(i > 0)
    def _():
        # ---- build the stacked bf16 conv operand: (K*Cc, B*T) --------------
        # rows [k*Cc:(k+1)*Cc], cols [b*T:(b+1)*T] hold the reflect-padded
        # input of batch b shifted by k*dilation.
        for b in range(B):                    # trace-time loop, static offsets
            zb = (x_ref[b] + yprev_ref[b]).astype(jnp.bfloat16)     # (Cc, T)
            zpad_ref[:, pad:pad + T] = zb
            for j in range(1, pad + 1):       # reflect borders (pad is tiny)
                zpad_ref[:, pad - j:pad - j + 1] = zb[:, j:j + 1]
                zpad_ref[:, pad + T - 1 + j:pad + T + j] = zb[:, T - 1 - j:T - j]
            for k in range(K):
                zstk_ref[k * Cc:(k + 1) * Cc, b * T:(b + 1) * T] = (
                    zpad_ref[:, k * d:k * d + T])
        # TODO(synk): for very large batch, roll these copy loops into a
        # lax.fori_loop / extra grid axis to bound program size.

        # ---- conv (+bias) + ReLU: one big MXU matmul, f32 accumulation -----
        h = jnp.dot(w_ref[0], zstk_ref[...],
                    preferred_element_type=jnp.float32)             # (Cc, B*T)
        h = jnp.maximum(h + bias_ref[0], 0.0)

        # ---- BatchNorm1d with batch stats (sum / sumsq, biased variance) ---
        inv_n = 1.0 / (B * T)
        s1 = jnp.sum(h, axis=1, keepdims=True)                      # (Cc, 1)
        s2 = jnp.sum(h * h, axis=1, keepdims=True)
        mean = s1 * inv_n
        var = jnp.maximum(s2 * inv_n - mean * mean, 0.0)
        scale_ = jax.lax.rsqrt(var + eps) * gamma_ref[0]
        shift_ = beta_ref[0] - mean * scale_
        y = h * scale_ + shift_                                     # (Cc, B*T)

        # ---- write the chunk and carry it for the next group ---------------
        for b in range(B):
            yb = y[:, b * T:(b + 1) * T]
            o_ref[b] = yb.astype(o_ref.dtype)
            yprev_ref[b] = yb


def res2net_block(x, weights, biases, gammas, betas, *,
                  scale, kernel_size, dilation, eps=1e-5):
    """Res2NetBlock forward.

    x:       (B, C, T) float32, channels-first (skip_transpose convention).
    weights: (scale-1, K, C//scale, C//scale)  -- [group, tap, out_ch, in_ch].
    biases / gammas / betas: (scale-1, C//scale, 1).
    """
    B, C, T = x.shape
    if C % scale != 0:
        raise ValueError("channels must be divisible by scale")
    Cc = C // scale
    if scale == 1:
        return x
    K = kernel_size
    pad = dilation * (K - 1) // 2                 # get_padding_elem, stride=1
    if pad >= T:
        raise ValueError("reflect padding requires dilation*(K-1)//2 < T")
    if Cc % 8 != 0:
        # TODO(synk): pad the channel chunk to a sublane multiple for tiny Cc.
        raise ValueError("C // scale must be a multiple of 8")
    Tpad = T + 2 * pad

    # Stack conv taps along the contraction dim: (G, K, Co, Ci) -> (G, Co, K*Ci)
    # and pre-cast to bf16 (the kernel accumulates in f32 on the MXU).
    wstk = jnp.transpose(weights, (0, 2, 1, 3)).reshape(
        scale - 1, Cc, K * Cc).astype(jnp.bfloat16)

    kern = functools.partial(_res2net_kernel, kernel_size=K,
                             dilation=dilation, pad=pad, eps=float(eps))

    chunk_map = lambda i: (0, i, 0)
    group_map = lambda i: (jnp.maximum(i - 1, 0), 0, 0)  # group i uses params[i-1]

    in_specs = [
        pl.BlockSpec((B, Cc, T), chunk_map),             # x, one chunk at a time
        pl.BlockSpec((1, Cc, K * Cc), group_map),        # stacked conv weights
        pl.BlockSpec((1, Cc, 1), group_map),             # conv bias
        pl.BlockSpec((1, Cc, 1), group_map),             # BN gamma
        pl.BlockSpec((1, Cc, 1), group_map),             # BN beta
    ]
    out_spec = pl.BlockSpec((B, Cc, T), chunk_map)

    # Rough VMEM budget: double-buffered chunk blocks + persistent scratch +
    # headroom for the in-flight activation values.
    chunk_bytes = B * Cc * T * 4
    est = (4 * chunk_bytes                                # x + out blocks, 2x buffered
           + 2 * (Cc * K * Cc * 2 + 3 * Cc * 4)           # params, 2x buffered
           + B * Cc * T * 4                               # y_{i-1} carry
           + Cc * Tpad * 2 + K * Cc * B * T * 2           # zpad + zstk (bf16)
           + 4 * Cc * B * T * 4                           # h / y values
           + (2 << 20))
    vmem_limit = int(min(max(est, 32 * 1024 * 1024), 100 * 1024 * 1024))

    return pl.pallas_call(
        kern,
        out_shape=jax.ShapeDtypeStruct((B, C, T), x.dtype),
        grid=(scale,),
        in_specs=in_specs,
        out_specs=out_spec,
        scratch_shapes=[
            pltpu.VMEM((B, Cc, T), jnp.float32),          # y_{i-1} carry
            pltpu.VMEM((Cc, Tpad), jnp.bfloat16),         # reflect-padded chunk
            pltpu.VMEM((K * Cc, B * T), jnp.bfloat16),    # stacked conv operand
        ],
        input_output_aliases={0: 0},                      # out reuses x's buffer
        compiler_params=pltpu.CompilerParams(
            dimension_semantics=("arbitrary",),           # serial residual chain
            vmem_limit_bytes=vmem_limit,
        ),
    )(x, wstk, biases, gammas, betas)
    # TODO(synk): for production T (e.g. 1500) and large B, add a time-tile grid
    # axis with two-pass BN (sum/sumsq accumulated across tiles) and halo loads.


def _ref_forward(x, weights, biases, gammas, betas, *,
                 scale, kernel_size, dilation, eps):
    """Pure-JAX reference of the Res2NetBlock forward (for sanity checking)."""
    B, C, T = x.shape
    Cc = C // scale
    pad = dilation * (kernel_size - 1) // 2
    chunks = [x[:, i * Cc:(i + 1) * Cc, :] for i in range(scale)]
    ys = [chunks[0]]
    y_prev = None
    for i in range(1, scale):
        z = chunks[i] if i == 1 else chunks[i] + y_prev
        zp = jnp.pad(z, ((0, 0), (0, 0), (pad, pad)), mode="reflect")
        h = jnp.zeros((B, Cc, T), jnp.float32)
        for k in range(kernel_size):
            h = h + jnp.einsum("oc,bct->bot", weights[i - 1, k],
                               zp[:, :, k * dilation:k * dilation + T])
        h = h + biases[i - 1][None]
        h = jnp.maximum(h, 0.0)
        mean = h.mean(axis=(0, 2), keepdims=True)
        var = ((h - mean) ** 2).mean(axis=(0, 2), keepdims=True)
        y = (h - mean) * jax.lax.rsqrt(var + eps) * gammas[i - 1][None] + betas[i - 1][None]
        ys.append(y)
        y_prev = y
    return jnp.concatenate(ys, axis=1)


if __name__ == "__main__":
    # Small shapes consistent with the module: (batch, channels, time).
    B, C, T = 2, 64, 16
    scale, kernel_size, dilation = 4, 3, 3
    Cc = C // scale

    key = jax.random.PRNGKey(0)
    kx, kw, kb, kg, kbe = jax.random.split(key, 5)

    x = jax.random.normal(kx, (B, C, T), dtype=jnp.float32)
    weights = 0.3 * jax.random.normal(kw, (scale - 1, kernel_size, Cc, Cc), dtype=jnp.float32)
    biases = 0.1 * jax.random.normal(kb, (scale - 1, Cc, 1), dtype=jnp.float32)
    gammas = 1.0 + 0.1 * jax.random.normal(kg, (scale - 1, Cc, 1), dtype=jnp.float32)
    betas = 0.05 * jax.random.normal(kbe, (scale - 1, Cc, 1), dtype=jnp.float32)

    # Reference first (pure f32 JAX), then the Pallas kernel.
    ref = _ref_forward(x, weights, biases, gammas, betas,
                       scale=scale, kernel_size=kernel_size, dilation=dilation, eps=1e-5)
    ref = jax.block_until_ready(ref)

    out = res2net_block(x, weights, biases, gammas, betas,
                        scale=scale, kernel_size=kernel_size, dilation=dilation)
    out = jax.block_until_ready(out)

    assert out.shape == (B, C, T)
    # bf16 MXU operands (f32 accumulate) -> slightly looser tolerance than pure f32.
    if not np.allclose(np.asarray(out), np.asarray(ref), rtol=3e-2, atol=3e-2):
        err = float(np.max(np.abs(np.asarray(out) - np.asarray(ref))))
        raise AssertionError(f"Pallas kernel mismatch vs JAX reference (max abs err {err:.4f})")
    print("KERNEL_OK")
</pallas_src>

<mosaic_0001>
module attributes {stable_mosaic.version = 11 : i64} {
  func.func @_res2net_kernel(%arg0: i32, %arg1: memref<2x16x16xf32, #tpu.memory_space<vmem>>, %arg2: memref<1x16x48xbf16, #tpu.memory_space<vmem>>, %arg3: memref<1x16x1xf32, #tpu.memory_space<vmem>>, %arg4: memref<1x16x1xf32, #tpu.memory_space<vmem>>, %arg5: memref<1x16x1xf32, #tpu.memory_space<vmem>>, %arg6: memref<2x16x16xf32, #tpu.memory_space<vmem>>, %arg7: memref<2x16x16xf32, #tpu.memory_space<vmem>>, %arg8: memref<16x22xbf16, #tpu.memory_space<vmem>>, %arg9: memref<48x32xbf16, #tpu.memory_space<vmem>>) attributes {dimension_semantics = [#tpu.dimension_semantics<arbitrary>], iteration_bounds = array<i64: 4>, scalar_prefetch = 0 : i64, scratch_operands = 3 : i64, tpu.core_type = #tpu.core_type<tc>, window_params = [{transform_indices = @transform_0, window_bounds = array<i64: 2, 16, 16>}, {transform_indices = @transform_1, window_bounds = array<i64: 1, 16, 48>}, {transform_indices = @transform_2, window_bounds = array<i64: 1, 16, 1>}, {transform_indices = @transform_3, window_bounds = array<i64: 1, 16, 1>}, {transform_indices = @transform_4, window_bounds = array<i64: 1, 16, 1>}, {transform_indices = @transform_5, window_bounds = array<i64: 2, 16, 16>}]} {
    %c0_i32 = arith.constant 0 : i32
    %0 = arith.cmpi eq, %arg0, %c0_i32 : i32
    %1 = arith.extui %0 : i1 to i32
    %c0_i32_0 = arith.constant 0 : i32
    %2 = arith.cmpi ne, %1, %c0_i32_0 : i32
    scf.if %2 {
      %c0 = arith.constant 0 : index
      %c0_3 = arith.constant 0 : index
      %c0_4 = arith.constant 0 : index
      %6 = vector.load %arg1[%c0, %c0_3, %c0_4] : memref<2x16x16xf32, #tpu.memory_space<vmem>>, vector<2x16x16xf32>
      %c0_5 = arith.constant 0 : index
      %c0_6 = arith.constant 0 : index
      %c0_7 = arith.constant 0 : index
      %7 = vector.load %arg6[%c0_5, %c0_6, %c0_7] : memref<2x16x16xf32, #tpu.memory_space<vmem>>, vector<2x16x16xf32>
      tpu.vector_store %arg6[%c0_5, %c0_6, %c0_7], %6 {strides = array<i32>} : memref<2x16x16xf32, #tpu.memory_space<vmem>>, vector<2x16x16xf32>,
      %cst = arith.constant 0.000000e+00 : f32
      %8 = vector.broadcast %cst : f32 to vector<2x16x16xf32>
      %c0_8 = arith.constant 0 : index
      %c0_9 = arith.constant 0 : index
      %c0_10 = arith.constant 0 : index
      %9 = vector.load %arg7[%c0_8, %c0_9, %c0_10] : memref<2x16x16xf32, #tpu.memory_space<vmem>>, vector<2x16x16xf32>
      tpu.vector_store %arg7[%c0_8, %c0_9, %c0_10], %8 {strides = array<i32>} : memref<2x16x16xf32, #tpu.memory_space<vmem>>, vector<2x16x16xf32>,
    } else {
    }
    %c0_i32_1 = arith.constant 0 : i32
    %3 = arith.cmpi sgt, %arg0, %c0_i32_1 : i32
    %4 = arith.extui %3 : i1 to i32
    %c0_i32_2 = arith.constant 0 : i32
    %5 = arith.cmpi ne, %4, %c0_i32_2 : i32
    scf.if %5 {
      %c0 = arith.constant 0 : index
      %c0_3 = arith.constant 0 : index
      %c0_4 = arith.constant 0 : index
      %6 = vector.load %arg1[%c0, %c0_3, %c0_4] : memref<2x16x16xf32, #tpu.memory_space<vmem>>, vector<1x16x16xf32>
      %7 = vector.shape_cast %6 : vector<1x16x16xf32> to vector<16x16xf32>
      %c0_5 = arith.constant 0 : index
      %c0_6 = arith.constant 0 : index
      %c0_7 = arith.constant 0 : index
      %8 = vector.load %arg7[%c0_5, %c0_6, %c0_7] : memref<2x16x16xf32, #tpu.memory_space<vmem>>, vector<1x16x16xf32>
      %9 = vector.shape_cast %8 : vector<1x16x16xf32> to vector<16x16xf32>
      %10 = arith.addf %7, %9 : vector<16x16xf32>
      %11 = arith.truncf %10 : vector<16x16xf32> to vector<16x16xbf16>
      %c0_8 = arith.constant 0 : index
      %c3 = arith.constant 3 : index
      %12 = vector.load %arg8[%c0_8, %c3] : memref<16x22xbf16, #tpu.memory_space<vmem>>, vector<16x16xbf16>
      tpu.vector_store %arg8[%c0_8, %c3], %11 {strides = array<i32>} : memref<16x22xbf16, #tpu.memory_space<vmem>>, vector<16x16xbf16>,
      %13 = vector.extract_strided_slice %11 {offsets = [0, 1], sizes = [16, 1], strides = [1, 1]} : vector<16x16xbf16> to vector<16x1xbf16>
      %c0_9 = arith.constant 0 : index
      %c2 = arith.constant 2 : index
      %14 = vector.load %arg8[%c0_9, %c2] : memref<16x22xbf16, #tpu.memory_space<vmem>>, vector<16x1xbf16>
      tpu.vector_store %arg8[%c0_9, %c2], %13 {strides = array<i32>} : memref<16x22xbf16, #tpu.memory_space<vmem>>, vector<16x1xbf16>,
      %15 = vector.extract_strided_slice %11 {offsets = [0, 14], sizes = [16, 1], strides = [1, 1]} : vector<16x16xbf16> to vector<16x1xbf16>
      %c0_10 = arith.constant 0 : index
      %c19 = arith.constant 19 : index
      %16 = vector.load %arg8[%c0_10, %c19] : memref<16x22xbf16, #tpu.memory_space<vmem>>, vector<16x1xbf16>
      tpu.vector_store %arg8[%c0_10, %c19], %15 {strides = array<i32>} : memref<16x22xbf16, #tpu.memory_space<vmem>>, vector<16x1xbf16>,
      %17 = vector.extract_strided_slice %11 {offsets = [0, 2], sizes = [16, 1], strides = [1, 1]} : vector<16x16xbf16> to vector<16x1xbf16>
      %c0_11 = arith.constant 0 : index
      %c1 = arith.constant 1 : index
      %18 = vector.load %arg8[%c0_11, %c1] : memref<16x22xbf16, #tpu.memory_space<vmem>>, vector<16x1xbf16>
      tpu.vector_store %arg8[%c0_11, %c1], %17 {strides = array<i32>} : memref<16x22xbf16, #tpu.memory_space<vmem>>, vector<16x1xbf16>,
      %19 = vector.extract_strided_slice %11 {offsets = [0, 13], sizes = [16, 1], strides = [1, 1]} : vector<16x16xbf16> to vector<16x1xbf16>
      %c0_12 = arith.constant 0 : index
      %c20 = arith.constant 20 : index
      %20 = vector.load %arg8[%c0_12, %c20] : memref<16x22xbf16, #tpu.memory_space<vmem>>, vector<16x1xbf16>
      tpu.vector_store %arg8[%c0_12, %c20], %19 {strides = array<i32>} : memref<16x22xbf16, #tpu.memory_space<vmem>>, vector<16x1xbf16>,
      %21 = vector.extract_strided_slice %11 {offsets = [0, 3], sizes = [16, 1], strides = [1, 1]} : vector<16x16xbf16> to vector<16x1xbf16>
      %c0_13 = arith.constant 0 : index
      %c0_14 = arith.constant 0 : index
      %22 = vector.load %arg8[%c0_13, %c0_14] : memref<16x22xbf16, #tpu.memory_space<vmem>>, vector<16x1xbf16>
      tpu.vector_store %arg8[%c0_13, %c0_14], %21 {strides = array<i32>} : memref<16x22xbf16, #tpu.memory_space<vmem>>, vector<16x1xbf16>,
      %23 = vector.extract_strided_slice %11 {offsets = [0, 12], sizes = [16, 1], strides = [1, 1]} : vector<16x16xbf16> to vector<16x1xbf16>
      %c0_15 = arith.constant 0 : index
      %c21 = arith.constant 21 : index
      %24 = vector.load %arg8[%c0_15, %c21] : memref<16x22xbf16, #tpu.memory_space<vmem>>, vector<16x1xbf16>
      tpu.vector_store %arg8[%c0_15, %c21], %23 {strides = array<i32>} : memref<16x22xbf16, #tpu.memory_space<vmem>>, vector<16x1xbf16>,
      %c0_16 = arith.constant 0 : index
      %c0_17 = arith.constant 0 : index
      %25 = vector.load %arg8[%c0_16, %c0_17] : memref<16x22xbf16, #tpu.memory_space<vmem>>, vector<16x16xbf16>
      %c0_18 = arith.constant 0 : index
      %c0_19 = arith.constant 0 : index
      %26 = vector.load %arg9[%c0_18, %c0_19] : memref<48x32xbf16, #tpu.memory_space<vmem>>, vector<16x16xbf16>
      tpu.vector_store %arg9[%c0_18, %c0_19], %25 {strides = array<i32>} : memref<48x32xbf16, #tpu.memory_space<vmem>>, vector<16x16xbf16>,
      %c0_20 = arith.constant 0 : index
      %c3_21 = arith.constant 3 : index
      %27 = vector.load %arg8[%c0_20, %c3_21] : memref<16x22xbf16, #tpu.memory_space<vmem>>, vector<16x16xbf16>
      %c16 = arith.constant 16 : index
      %c0_22 = arith.constant 0 : index
      %28 = vector.load %arg9[%c16, %c0_22] : memref<48x32xbf16, #tpu.memory_space<vmem>>, vector<16x16xbf16>
      tpu.vector_store %arg9[%c16, %c0_22], %27 {strides = array<i32>} : memref<48x32xbf16, #tpu.memory_space<vmem>>, vector<16x16xbf16>,
      %c0_23 = arith.constant 0 : index
      %c6 = arith.constant 6 : index
      %29 = vector.load %arg8[%c0_23, %c6] : memref<16x22xbf16, #tpu.memory_space<vmem>>, vector<16x16xbf16>
      %c32 = arith.constant 32 : index
      %c0_24 = arith.constant 0 : index
      %30 = vector.load %arg9[%c32, %c0_24] : memref<48x32xbf16, #tpu.memory_space<vmem>>, vector<16x16xbf16>
      tpu.vector_store %arg9[%c32, %c0_24], %29 {strides = array<i32>} : memref<48x32xbf16, #tpu.memory_space<vmem>>, vector<16x16xbf16>,
      %c1_25 = arith.constant 1 : index
      %c0_26 = arith.constant 0 : index
      %c0_27 = arith.constant 0 : index
      %31 = vector.load %arg1[%c1_25, %c0_26, %c0_27] : memref<2x16x16xf32, #tpu.memory_space<vmem>>, vector<1x16x16xf32>
      %32 = vector.shape_cast %31 : vector<1x16x16xf32> to vector<16x16xf32>
      %c1_28 = arith.constant 1 : index
      %c0_29 = arith.constant 0 : index
      %c0_30 = arith.constant 0 : index
      %33 = vector.load %arg7[%c1_28, %c0_29, %c0_30] : memref<2x16x16xf32, #tpu.memory_space<vmem>>, vector<1x16x16xf32>
      %34 = vector.shape_cast %33 : vector<1x16x16xf32> to vector<16x16xf32>
      %35 = arith.addf %32, %34 : vector<16x16xf32>
      %36 = arith.truncf %35 : vector<16x16xf32> to vector<16x16xbf16>
      %c0_31 = arith.constant 0 : index
      %c3_32 = arith.constant 3 : index
      %37 = vector.load %arg8[%c0_31, %c3_32] : memref<16x22xbf16, #tpu.memory_space<vmem>>, vector<16x16xbf16>
      tpu.vector_store %arg8[%c0_31, %c3_32], %36 {strides = array<i32>} : memref<16x22xbf16, #tpu.memory_space<vmem>>, vector<16x16xbf16>,
      %38 = vector.extract_strided_slice %36 {offsets = [0, 1], sizes = [16, 1], strides = [1, 1]} : vector<16x16xbf16> to vector<16x1xbf16>
      %c0_33 = arith.constant 0 : index
      %c2_34 = arith.constant 2 : index
      %39 = vector.load %arg8[%c0_33, %c2_34] : memref<16x22xbf16, #tpu.memory_space<vmem>>, vector<16x1xbf16>
      tpu.vector_store %arg8[%c0_33, %c2_34], %38 {strides = array<i32>} : memref<16x22xbf16, #tpu.memory_space<vmem>>, vector<16x1xbf16>,
      %40 = vector.extract_strided_slice %36 {offsets = [0, 14], sizes = [16, 1], strides = [1, 1]} : vector<16x16xbf16> to vector<16x1xbf16>
      %c0_35 = arith.constant 0 : index
      %c19_36 = arith.constant 19 : index
      %41 = vector.load %arg8[%c0_35, %c19_36] : memref<16x22xbf16, #tpu.memory_space<vmem>>, vector<16x1xbf16>
      tpu.vector_store %arg8[%c0_35, %c19_36], %40 {strides = array<i32>} : memref<16x22xbf16, #tpu.memory_space<vmem>>, vector<16x1xbf16>,
      %42 = vector.extract_strided_slice %36 {offsets = [0, 2], sizes = [16, 1], strides = [1, 1]} : vector<16x16xbf16> to vector<16x1xbf16>
      %c0_37 = arith.constant 0 : index
      %c1_38 = arith.constant 1 : index
      %43 = vector.load %arg8[%c0_37, %c1_38] : memref<16x22xbf16, #tpu.memory_space<vmem>>, vector<16x1xbf16>
      tpu.vector_store %arg8[%c0_37, %c1_38], %42 {strides = array<i32>} : memref<16x22xbf16, #tpu.memory_space<vmem>>, vector<16x1xbf16>,
      %44 = vector.extract_strided_slice %36 {offsets = [0, 13], sizes = [16, 1], strides = [1, 1]} : vector<16x16xbf16> to vector<16x1xbf16>
      %c0_39 = arith.constant 0 : index
      %c20_40 = arith.constant 20 : index
      %45 = vector.load %arg8[%c0_39, %c20_40] : memref<16x22xbf16, #tpu.memory_space<vmem>>, vector<16x1xbf16>
      tpu.vector_store %arg8[%c0_39, %c20_40], %44 {strides = array<i32>} : memref<16x22xbf16, #tpu.memory_space<vmem>>, vector<16x1xbf16>,
      %46 = vector.extract_strided_slice %36 {offsets = [0, 3], sizes = [16, 1], strides = [1, 1]} : vector<16x16xbf16> to vector<16x1xbf16>
      %c0_41 = arith.constant 0 : index
      %c0_42 = arith.constant 0 : index
      %47 = vector.load %arg8[%c0_41, %c0_42] : memref<16x22xbf16, #tpu.memory_space<vmem>>, vector<16x1xbf16>
      tpu.vector_store %arg8[%c0_41, %c0_42], %46 {strides = array<i32>} : memref<16x22xbf16, #tpu.memory_space<vmem>>, vector<16x1xbf16>,
      %48 = vector.extract_strided_slice %36 {offsets = [0, 12], sizes = [16, 1], strides = [1, 1]} : vector<16x16xbf16> to vector<16x1xbf16>
      %c0_43 = arith.constant 0 : index
      %c21_44 = arith.constant 21 : index
      %49 = vector.load %arg8[%c0_43, %c21_44] : memref<16x22xbf16, #tpu.memory_space<vmem>>, vector<16x1xbf16>
      tpu.vector_store %arg8[%c0_43, %c21_44], %48 {strides = array<i32>} : memref<16x22xbf16, #tpu.memory_space<vmem>>, vector<16x1xbf16>,
      %c0_45 = arith.constant 0 : index
      %c0_46 = arith.constant 0 : index
      %50 = vector.load %arg8[%c0_45, %c0_46] : memref<16x22xbf16, #tpu.memory_space<vmem>>, vector<16x16xbf16>
      %c0_47 = arith.constant 0 : index
      %c16_48 = arith.constant 16 : index
      %51 = vector.load %arg9[%c0_47, %c16_48] : memref<48x32xbf16, #tpu.memory_space<vmem>>, vector<16x16xbf16>
      tpu.vector_store %arg9[%c0_47, %c16_48], %50 {strides = array<i32>} : memref<48x32xbf16, #tpu.memory_space<vmem>>, vector<16x16xbf16>,
      %c0_49 = arith.constant 0 : index
      %c3_50 = arith.constant 3 : index
      %52 = vector.load %arg8[%c0_49, %c3_50] : memref<16x22xbf16, #tpu.memory_space<vmem>>, vector<16x16xbf16>
      %c16_51 = arith.constant 16 : index
      %c16_52 = arith.constant 16 : index
      %53 = vector.load %arg9[%c16_51, %c16_52] : memref<48x32xbf16, #tpu.memory_space<vmem>>, vector<16x16xbf16>
      tpu.vector_store %arg9[%c16_51, %c16_52], %52 {strides = array<i32>} : memref<48x32xbf16, #tpu.memory_space<vmem>>, vector<16x16xbf16>,
      %c0_53 = arith.constant 0 : index
      %c6_54 = arith.constant 6 : index
      %54 = vector.load %arg8[%c0_53, %c6_54] : memref<16x22xbf16, #tpu.memory_space<vmem>>, vector<16x16xbf16>
      %c32_55 = arith.constant 32 : index
      %c16_56 = arith.constant 16 : index
      %55 = vector.load %arg9[%c32_55, %c16_56] : memref<48x32xbf16, #tpu.memory_space<vmem>>, vector<16x16xbf16>
      tpu.vector_store %arg9[%c32_55, %c16_56], %54 {strides = array<i32>} : memref<48x32xbf16, #tpu.memory_space<vmem>>, vector<16x16xbf16>,
      %c0_57 = arith.constant 0 : index
      %c0_58 = arith.constant 0 : index
      %c0_59 = arith.constant 0 : index
      %56 = vector.load %arg2[%c0_57, %c0_58, %c0_59] : memref<1x16x48xbf16, #tpu.memory_space<vmem>>, vector<1x16x48xbf16>
      %57 = vector.shape_cast %56 : vector<1x16x48xbf16> to vector<16x48xbf16>
      %c0_60 = arith.constant 0 : index
      %c0_61 = arith.constant 0 : index
      %58 = vector.load %arg9[%c0_60, %c0_61] : memref<48x32xbf16, #tpu.memory_space<vmem>>, vector<48x32xbf16>
      %cst = arith.constant dense<0.000000e+00> : vector<16x32xf32>
      %59 = tpu.matmul %57, %58, %cst {dimension_numbers = #tpu.dot_dimension_numbers<[1], [0], [0], [1], [0, 0, 1, 1], [], []>} : vector<16x48xbf16>, vector<48x32xbf16>, vector<16x32xf32> -> vector<16x32xf32>
      %c0_62 = arith.constant 0 : index
      %c0_63 = arith.constant 0 : index
      %c0_64 = arith.constant 0 : index
      %60 = vector.load %arg3[%c0_62, %c0_63, %c0_64] : memref<1x16x1xf32, #tpu.memory_space<vmem>>, vector<1x16x1xf32>
      %61 = vector.shape_cast %60 : vector<1x16x1xf32> to vector<16x1xf32>
      %62 = vector.broadcast %61 : vector<16x1xf32> to vector<16x32xf32>
      %63 = arith.addf %59, %62 : vector<16x32xf32>
      %cst_65 = arith.constant 0.000000e+00 : f32
      %64 = vector.broadcast %cst_65 : f32 to vector<16x32xf32>
      %65 = arith.maximumf %63, %64 : vector<16x32xf32>
      %cst_66 = arith.constant dense<0.000000e+00> : vector<16xf32>
      %66 = vector.multi_reduction <add>, %65, %cst_66 [1] : vector<16x32xf32> to vector<16xf32>
      %67 = vector.shape_cast %66 : vector<16xf32> to vector<16x1xf32>
      %68 = arith.mulf %65, %65 : vector<16x32xf32>
      %cst_67 = arith.constant dense<0.000000e+00> : vector<16xf32>
      %69 = vector.multi_reduction <add>, %68, %cst_67 [1] : vector<16x32xf32> to vector<16xf32>
      %70 = vector.shape_cast %69 : vector<16xf32> to vector<16x1xf32>
      %cst_68 = arith.constant 3.125000e-02 : f32
      %71 = vector.broadcast %cst_68 : f32 to vector<16x1xf32>
      %72 = arith.mulf %67, %71 : vector<16x1xf32>
      %cst_69 = arith.constant 3.125000e-02 : f32
      %73 = vector.broadcast %cst_69 : f32 to vector<16x1xf32>
      %74 = arith.mulf %70, %73 : vector<16x1xf32>
      %75 = arith.mulf %72, %72 : vector<16x1xf32>
      %76 = arith.subf %74, %75 : vector<16x1xf32>
      %cst_70 = arith.constant 0.000000e+00 : f32
      %77 = vector.broadcast %cst_70 : f32 to vector<16x1xf32>
      %78 = arith.maximumf %76, %77 : vector<16x1xf32>
      %cst_71 = arith.constant 9.99999974E-6 : f32
      %79 = vector.broadcast %cst_71 : f32 to vector<16x1xf32>
      %80 = arith.addf %78, %79 : vector<16x1xf32>
      %81 = math.rsqrt %80 : vector<16x1xf32>
      %c0_72 = arith.constant 0 : index
      %c0_73 = arith.constant 0 : index
      %c0_74 = arith.constant 0 : index
      %82 = vector.load %arg4[%c0_72, %c0_73, %c0_74] : memref<1x16x1xf32, #tpu.memory_space<vmem>>, vector<1x16x1xf32>
      %83 = vector.shape_cast %82 : vector<1x16x1xf32> to vector<16x1xf32>
      %84 = arith.mulf %81, %83 : vector<16x1xf32>
      %c0_75 = arith.constant 0 : index
      %c0_76 = arith.constant 0 : index
      %c0_77 = arith.constant 0 : index
      %85 = vector.load %arg5[%c0_75, %c0_76, %c0_77] : memref<1x16x1xf32, #tpu.memory_space<vmem>>, vector<1x16x1xf32>
      %86 = vector.shape_cast %85 : vector<1x16x1xf32> to vector<16x1xf32>
      %87 = arith.mulf %72, %84 : vector<16x1xf32>
      %88 = arith.subf %86, %87 : vector<16x1xf32>
      %89 = vector.broadcast %84 : vector<16x1xf32> to vector<16x32xf32>
      %90 = arith.mulf %65, %89 : vector<16x32xf32>
      %91 = vector.broadcast %88 : vector<16x1xf32> to vector<16x32xf32>
      %92 = arith.addf %90, %91 : vector<16x32xf32>
      %93 = vector.extract_strided_slice %92 {offsets = [0, 0], sizes = [16, 16], strides = [1, 1]} : vector<16x32xf32> to vector<16x16xf32>
      %c0_78 = arith.constant 0 : index
      %c0_79 = arith.constant 0 : index
      %c0_80 = arith.constant 0 : index
      %94 = vector.load %arg6[%c0_78, %c0_79, %c0_80] : memref<2x16x16xf32, #tpu.memory_space<vmem>>, vector<1x16x16xf32>
      %95 = vector.shape_cast %94 : vector<1x16x16xf32> to vector<16x16xf32>
      %96 = vector.shape_cast %93 : vector<16x16xf32> to vector<1x16x16xf32>
      tpu.vector_store %arg6[%c0_78, %c0_79, %c0_80], %96 {strides = array<i32>} : memref<2x16x16xf32, #tpu.memory_space<vmem>>, vector<1x16x16xf32>,
      %c0_81 = arith.constant 0 : index
      %c0_82 = arith.constant 0 : index
      %c0_83 = arith.constant 0 : index
      %97 = vector.load %arg7[%c0_81, %c0_82, %c0_83] : memref<2x16x16xf32, #tpu.memory_space<vmem>>, vector<1x16x16xf32>
      %98 = vector.shape_cast %97 : vector<1x16x16xf32> to vector<16x16xf32>
      %99 = vector.shape_cast %93 : vector<16x16xf32> to vector<1x16x16xf32>
      tpu.vector_store %arg7[%c0_81, %c0_82, %c0_83], %99 {strides = array<i32>} : memref<2x16x16xf32, #tpu.memory_space<vmem>>, vector<1x16x16xf32>,
      %100 = vector.extract_strided_slice %92 {offsets = [0, 16], sizes = [16, 16], strides = [1, 1]} : vector<16x32xf32> to vector<16x16xf32>
      %c1_84 = arith.constant 1 : index
      %c0_85 = arith.constant 0 : index
      %c0_86 = arith.constant 0 : index
      %101 = vector.load %arg6[%c1_84, %c0_85, %c0_86] : memref<2x16x16xf32, #tpu.memory_space<vmem>>, vector<1x16x16xf32>
      %102 = vector.shape_cast %101 : vector<1x16x16xf32> to vector<16x16xf32>
      %103 = vector.shape_cast %100 : vector<16x16xf32> to vector<1x16x16xf32>
      tpu.vector_store %arg6[%c1_84, %c0_85, %c0_86], %103 {strides = array<i32>} : memref<2x16x16xf32, #tpu.memory_space<vmem>>, vector<1x16x16xf32>,
      %c1_87 = arith.constant 1 : index
      %c0_88 = arith.constant 0 : index
      %c0_89 = arith.constant 0 : index
      %104 = vector.load %arg7[%c1_87, %c0_88, %c0_89] : memref<2x16x16xf32, #tpu.memory_space<vmem>>, vector<1x16x16xf32>
      %105 = vector.shape_cast %104 : vector<1x16x16xf32> to vector<16x16xf32>
      %106 = vector.shape_cast %100 : vector<16x16xf32> to vector<1x16x16xf32>
      tpu.vector_store %arg7[%c1_87, %c0_88, %c0_89], %106 {strides = array<i32>} : memref<2x16x16xf32, #tpu.memory_space<vmem>>, vector<1x16x16xf32>,
    } else {
    }
    return
  }
  func.func @transform_0(%arg0: i32) -> (i32, i32, i32) {
    %c0_i32 = arith.constant 0 : i32
    %c0_i32_0 = arith.constant 0 : i32
    %c0_i32_1 = arith.constant 0 : i32
    return %c0_i32, %arg0, %c0_i32_0 : i32, i32, i32
  }
  func.func @transform_1(%arg0: i32) -> (i32, i32, i32) {
    %c1_i32 = arith.constant 1 : i32
    %0 = arith.subi %arg0, %c1_i32 : i32
    %c0_i32 = arith.constant 0 : i32
    %1 = arith.maxsi %0, %c0_i32 : i32
    %c0_i32_0 = arith.constant 0 : i32
    %c0_i32_1 = arith.constant 0 : i32
    %c0_i32_2 = arith.constant 0 : i32
    return %1, %c0_i32_0, %c0_i32_1 : i32, i32, i32
  }
  func.func @transform_2(%arg0: i32) -> (i32, i32, i32) {
    %c1_i32 = arith.constant 1 : i32
    %0 = arith.subi %arg0, %c1_i32 : i32
    %c0_i32 = arith.constant 0 : i32
    %1 = arith.maxsi %0, %c0_i32 : i32
    %c0_i32_0 = arith.constant 0 : i32
    %c0_i32_1 = arith.constant 0 : i32
    %c0_i32_2 = arith.constant 0 : i32
    return %1, %c0_i32_0, %c0_i32_1 : i32, i32, i32
  }
  func.func @transform_3(%arg0: i32) -> (i32, i32, i32) {
    %c1_i32 = arith.constant 1 : i32
    %0 = arith.subi %arg0, %c1_i32 : i32
    %c0_i32 = arith.constant 0 : i32
    %1 = arith.maxsi %0, %c0_i32 : i32
    %c0_i32_0 = arith.constant 0 : i32
    %c0_i32_1 = arith.constant 0 : i32
    %c0_i32_2 = arith.constant 0 : i32
    return %1, %c0_i32_0, %c0_i32_1 : i32, i32, i32
  }
  func.func @transform_4(%arg0: i32) -> (i32, i32, i32) {
    %c1_i32 = arith.constant 1 : i32
    %0 = arith.subi %arg0, %c1_i32 : i32
    %c0_i32 = arith.constant 0 : i32
    %1 = arith.maxsi %0, %c0_i32 : i32
    %c0_i32_0 = arith.constant 0 : i32
    %c0_i32_1 = arith.constant 0 : i32
    %c0_i32_2 = arith.constant 0 : i32
    return %1, %c0_i32_0, %c0_i32_1 : i32, i32, i32
  }
  func.func @transform_5(%arg0: i32) -> (i32, i32, i32) {
    %c0_i32 = arith.constant 0 : i32
    %c0_i32_0 = arith.constant 0 : i32
    %c0_i32_1 = arith.constant 0 : i32
    return %c0_i32, %arg0, %c0_i32_0 : i32, i32, i32
  }
}

</mosaic_0001>

<bundles_post_ra>
// kernel: tpu_custom_call.1
= control target key start
LH: loop header
LB: loop body
LE: loop exit
PB: predicated region body
PF: predicated region fallthrough
CT: control target
= control target key end

     0   :  { %s1084_s18 = smov 0   ;;  %s1086_s19 = smov 0   ;;  %s1226_s0 = inlined_call_operand.vmem [shape: f32[2,64,16], index: 0, kind: input, shape index: {}, may-alias: {0,5}]   ;;  %s1227_s1 = inlined_call_operand.vmem [shape: bf16[3,16,48], index: 1, kind: input, shape index: {}]   ;;  %s1228_s2 = inlined_call_operand.vmem [shape: f32[3,16,1], index: 2, kind: input, shape index: {}]   ;;  %s1229_s3 = inlined_call_operand.vmem [shape: f32[3,16,1], index: 3, kind: input, shape index: {}]   ;;  %s1230_s4 = inlined_call_operand.vmem [shape: f32[3,16,1], index: 4, kind: input, shape index: {}]   ;;  %s1231_s5 = inlined_call_operand.vmem [shape: f32[2,64,16], index: 5, kind: output, shape index: {}, may-alias: {0,5}]  }
   0x1   :  { %s1088_s20 = smov 0  }
   0x2 LB: > { %s1100_s21 = sadd.s32 4294967295, %s1036_s20   ;;  %s1103_s22 = sadd.s32 1, %s1036_s20   ;;  %s1036_s20 = sphi %s1088_s20, %s1235_s20   ;;  %s1032_s19 = sphi %s1086_s19, %s1234_s19   ;;  %s1028_s18 = sphi %s1084_s18, %s1233_s18  }
   0x3   : > { %s19_s23 = ssub.s32 %s1036_s20, %s1103_s22  ;;  %s22_s24 = sadd.s32 1, %s1032_s19 }
   0x4   : > { %p20_p0 = scmp.eq.s32.totalorder %s19_s23, 0  ;;  %p29_p1 = scmp.ne.s32.totalorder %s1032_s19, %s1028_s18 }
   0x5   : > { %p30_p2 = scmp.eq.s32.totalorder %s1036_s20, 0  ;;  %p187_p3 = scmp.eq.s32.totalorder %s1100_s21, 3 }
   0x6   : > { %s1113_s25 = scalar_select %p20_p0, %s1032_s19, %s22_s24  }
   0x7   : > { %p31_p4 = por %p30_p2, %p29_p1  ;;  %p1115_p5 = por %p187_p3, %p29_p1 }
   0x8   : > { %p887_p6 = scmp.ge.s32.totalorder %s1036_s20, 4 }
   0xa   : > { %209 = sbr.rel (%p887_p6) target bundleno = 24 (0x18), region = 16 }
  0x11   : > { %212 = sbr.rel (!%p31_p4) target bundleno = 24 (0x18), region = 20  ;;  %s214_s27 = sand.u32 (%p31_p4), 1, %s1032_s19  }
  0x12   : > { %s939_s28 = sshll.u32 (%p31_p4), %s1036_s20, 4  ;;  %s888_s29 = sshll.u32 (%p31_p4), %s214_s27, 5 }
  0x13   : > { %s219_s7 = scalar_lea.vmem (%p31_p4), %s1226_s0, %s939_s28  ;;  %s216_s8 = scalar_lea.vmem (%p31_p4), [#allocation5], %s888_s29 }
  0x14   : > { %v253_v0 = vld [vmem:[%s219_s7] sm:$0xff] (%p31_p4)  ;;  %v255_v1 = vld [vmem:[%s219_s7 + $0x8] sm:$0xff] (%p31_p4) }
  0x15   : > { %v257_v2 = vld [vmem:[%s219_s7 + $0x40] sm:$0xff] (%p31_p4)  ;;  %254 = vst [vmem:[%s216_s8] sm:$0xff] (%p31_p4), %v253_v0  ;;  %256 = vst [vmem:[%s216_s8 + $0x8] sm:$0xff] (%p31_p4), %v255_v1  ;;  %v259_v3 = vld [vmem:[%s219_s7 + $0x48] sm:$0xff] (%p31_p4) }
  0x16   : > { %258 = vst [vmem:[%s216_s8 + $0x10] sm:$0xff] (%p31_p4), %v257_v2  ;;  %260 = vst [vmem:[%s216_s8 + $0x18] sm:$0xff] (%p31_p4), %v259_v3 }
  0x18 PF: > { %p891_p7 = scmp.ge.s32.totalorder %s1036_s20, 1  ;;  %p321_p8 = scmp.lt.s32.totalorder %s1036_s20, 5 }
  0x1a   : > { %p322_p9 = pnand %p891_p7, %p321_p8 }
  0x1b   : > { %s328_s9 = sand.u32 (!%p322_p9), 1, %s1028_s18   ;;  %s894_s10 = sadd.s32 (!%p322_p9), 4294967295, %s1100_s21 }
  0x1c   : > { %325 = sbr.rel (%p322_p9) target bundleno = 981 (0x3d5), region = 74  ;;  %s892_s11 = sshll.u32 (!%p322_p9), %s328_s9, 5 }
  0x1d   : > { %p388_p10 = scmp.gt.s32.totalorder (!%p322_p9), %s894_s10, 0  ;;  %p895_p11 = scmp.lt.s32.totalorder (!%p322_p9), %s894_s10, 2 }
  0x1e   : > { %s1149_s7 = scalar_lea.vmem (!%p322_p9), [#allocation5], %s892_s11  ;;  %s1151_s8 = scalar_lea.vmem (!%p322_p9), [#allocation6], %s892_s11 }
  0x1f   : > { %p926_p12 = scmp.ne.s32.totalorder (!%p322_p9), %s1100_s21, 0 }
  0x23   : > { %s389_s12 = scalar_select %p388_p10, %s894_s10, 0 }
  0x24   : > { %436 = sbr.rel (%p926_p12) target bundleno = 43 (0x2b), region = 82  ;;  %v437_v4 = vld [vmem:[%s1149_s7] sm:$0xff] (!%p926_p12)  ;;  %vm441_vm0 = vcmask (!%p926_p12), 130048   ;;  %v438_v5 = vld [vmem:[%s1149_s7 + $0x8] sm:$0xff] (!%p926_p12)  ;;  %v439_v6 = vld [vmem:[%s1149_s7 + $0x10] sm:$0xff] (!%p926_p12)  ;;  %v1038_v8 = vmov (!%p926_p12), 0.0  }
  0x25   : > { %s1237_s12 = smov (!%p895_p11, %s389_s12), 2  ;;  %442 = vst.msk [vmem:[%s1151_s8] sm:$0xff] (!%p926_p12), %vm441_vm0, %v437_v4  ;;  %443 = vst.msk [vmem:[%s1151_s8 + $0x8] sm:$0xff] (!%p926_p12), %vm441_vm0, %v438_v5  ;;  %v440_v7 = vld [vmem:[%s1149_s7 + $0x18] sm:$0xff] (!%p926_p12) }
  0x26   : > { %s942_s13 = sshll.u32 %s1237_s12, 3  ;;  %s945_s14 = sshll.u32 %s1237_s12, 4  ;;  %444 = vst.msk [vmem:[%s1151_s8 + $0x10] sm:$0xff] (!%p926_p12), %vm441_vm0, %v439_v6  ;;  %446 = vst.msk [vmem:[#allocation2] sm:$0xff] (!%p926_p12), %vm441_vm0, %v1038_v8 }
  0x27   : > { %s1132_s17 = scalar_lea.vmem %s1227_s1, %s942_s13  ;;  %s1137_s24 = scalar_lea.vmem %s1228_s2, %s945_s14  ;;  %447 = vst.msk [vmem:[#allocation2 + $0x8] sm:$0xff] (!%p926_p12), %vm441_vm0, %v1038_v8  ;;  %448 = vst.msk [vmem:[#allocation2 + $0x10] sm:$0xff] (!%p926_p12), %vm441_vm0, %v1038_v8 }
  0x28   : > { %s1142_s28 = scalar_lea.vmem %s1229_s3, %s945_s14  ;;  %s1147_s6 = scalar_lea.vmem %s1230_s4, %s945_s14  ;;  %449 = vst.msk [vmem:[#allocation2 + $0x18] sm:$0xff] (!%p926_p12), %vm441_vm0, %v1038_v8  ;;  %445 = vst.msk [vmem:[%s1151_s8 + $0x18] sm:$0xff] (!%p926_p12), %vm441_vm0, %v440_v7 }
  0x2b PF: > { %p927_p13 = scmp.le.s32.totalorder %s1100_s21, 0 }
  0x2c   : > { %v454_v9 = vld [vmem:[%s1149_s7] sm:$0xff] (!%p927_p13)  ;;  %v455_v10 = vld [vmem:[%s1149_s7 + $0x8] sm:$0xff] (!%p927_p13)  ;;  %s1039_s9 = smov (!%p927_p13), 3   ;;  %s1040_s10 = smov (!%p927_p13), 5   ;;  %v928_v16 = vld [vmem:[%s1149_s7 + $0x10] sm:$0xff] (!%p927_p13)  ;;  %vm465_vm1 = vcmask (!%p927_p13), 154648  }
  0x2d   : > { %453 = sbr.rel (%p927_p13) target bundleno = 973 (0x3cd), region = 86  ;;  %v456_v11 = vld [vmem:[#allocation2] sm:$0xff] (!%p927_p13)  ;;  %v929_v17 = vld [vmem:[%s1149_s7 + $0x18] sm:$0xff] (!%p927_p13)  ;;  %s1041_s11 = smov (!%p927_p13), 1   ;;  %vm470_vm2 = vcmask (!%p927_p13), 23568   ;;  %vm475_vm3 = vcmask (!%p927_p13), 162968  }
  0x2e   : > { %v457_v12 = vld [vmem:[#allocation2 + $0x8] sm:$0xff] (!%p927_p13)  ;;  %v458_v13 = vadd.f32 (!%p927_p13), %v456_v11, %v454_v9  ;;  %v516_v18 = vld [vmem:[#allocation2 + $0x10] sm:$0xff] (!%p927_p13)  ;;  %s1042_s12 = smov (!%p927_p13), 127   ;;  %s1043_s13 = smov (!%p927_p13), 7   ;;  %vm480_vm4 = vcmask (!%p927_p13), 15368   ;;  %vm485_vm5 = vcmask (!%p927_p13), 171168  }
  0x2f   : > { %v459_v14 = vadd.f32 (!%p927_p13), %v457_v12, %v455_v10  ;;  %v517_v19 = vld [vmem:[#allocation2 + $0x18] sm:$0xff] (!%p927_p13)  ;;  %v518_v20 = vadd.f32 (!%p927_p13), %v928_v16, %v516_v18  ;;  %s1044_s14 = smov (!%p927_p13), 125   ;;  %s1045_s15 = smov (!%p927_p13), 9   ;;  %vm490_vm6 = vcmask (!%p927_p13), 7168   ;;  %vm495_vm7 = vcmask (!%p927_p13), 179368   ;;  %v574_v40 = vld [vmem:[%s1137_s24] sm:$0xff] (!%p927_p13) }
  0x30   : > { %v519_v21 = vadd.f32 (!%p927_p13), %v929_v17, %v517_v19  ;;  %vm498_vm8 = vcmask (!%p927_p13), 130048   ;;  %s1046_s16 = smov (!%p927_p13), 122   ;;  %v1047_v38 = vmov (!%p927_p13), 0.0   ;;  %s1048_s23 = smov (!%p927_p13), 16   ;;  %vm1050_vm9 = vmmov (!%p927_p13), 0   ;;  %v575_v42 = vld [vmem:[%s1137_s24 + $0x8] sm:$0xff] (!%p927_p13) }
  0x31   : > { %v460_v15 = vpack.c.bf16 (!%p927_p13), %v459_v14, %v458_v13  ;;  %957 = vmatprep.subr.bf16.mxu0 (!%p927_p13), %v1047_v38  ;;  %s1049_s20 = smov (!%p927_p13), 13   ;;  %963 = vmatprep.mubr.msk.bf16.mxu0 (!%p927_p13), %vm1050_vm9, %v1047_v38  ;;  %v1051_v41 = vmov (!%p927_p13), 0   ;;  %s1052_s27 = smov (!%p927_p13), 10   ;;  %vm555_vm10 = vcmask (!%p927_p13), 261248   ;;  %v1009_v51 = vld [vmem:[%s1132_s17] sm:$0xff] (!%p927_p13)   ;;  %vm591_vm11 = vcmask (!%p927_p13), 392192  }
  0x32   : > { %v520_v22 = vpack.c.bf16 (!%p927_p13), %v519_v21, %v518_v20  ;;  %1007 = vset.pattern.permute.xlu1 (!%p927_p13), %v1051_v41  ;;  %1008 = vset.pattern.permute.xlu0 (!%p927_p13), %v1051_v41  ;;  %vm638_vm12 = vcmask (!%p927_p13), 261120   ;;  %v667_v20 = vld [vmem:[%s1142_s28] sm:$0xff] (!%p927_p13)  ;;  %s1053_s17 = smov (!%p927_p13), 112  }
  0x33   : > { %462 = vrot.lane.b32.xlu0 (!%p927_p13), %v460_v15, %s1039_s9  ;;  %472 = vrot.lane.b32.xlu1 (!%p927_p13), %v460_v15, %s1040_s10 }
  0x37   : > { %467 = vrot.lane.b32.xlu0 %v460_v15, %s1041_s11  ;;  %477 = vrot.lane.b32.xlu1 %v460_v15, %s1042_s12 }
  0x3b   : > { %482 = vrot.lane.b32.xlu0 %v460_v15, %s1043_s13  ;;  %487 = vrot.lane.b32.xlu1 %v460_v15, %s1044_s14 }
  0x3f   : > { %492 = vrot.lane.b32.xlu0 %v460_v15, %s1045_s15  ;;  %522 = vrot.lane.b32.xlu1 %v520_v22, %s1039_s9 }
  0x43   : > { %526 = vrot.lane.b32.xlu0 %v520_v22, %s1041_s11  ;;  %530 = vrot.lane.b32.xlu1 %v520_v22, %s1040_s10 }
  0x47   : > { %534 = vrot.lane.b32.xlu0 %v520_v22, %s1042_s12  ;;  %538 = vrot.lane.b32.xlu1 %v520_v22, %s1043_s13 }
  0x4b   : > { %542 = vrot.lane.b32.xlu0 %v520_v22, %s1044_s14  ;;  %546 = vrot.lane.b32.xlu1 %v520_v22, %s1045_s15  ;;  %v668_v22 = vld [vmem:[%s1142_s28 + $0x8] sm:$0xff] }
  0xa5   : > { %v463_v23 = vpop.permute.xlu0 %462  ;;  %v473_v24 = vpop.permute.xlu1 %472 }
  0xa6   : > { %466 = vst.msk [vmem:[#allocation3] sm:$0xff] %vm465_vm1, %v463_v23 }
  0xa9   : > { %v468_v25 = vpop.permute.xlu0 %467  ;;  %v478_v26 = vpop.permute.xlu1 %477 }
  0xaa   : > { %471 = vst.msk [vmem:[#allocation3] sm:$0xff] %vm470_vm2, %v468_v25  ;;  %v671_v25 = vld [vmem:[%s1147_s6] sm:$0xff] }
  0xab   : > { %476 = vst.msk [vmem:[#allocation3] sm:$0xff] %vm475_vm3, %v473_v24 }
  0xac   : > { %481 = vst.msk [vmem:[#allocation3] sm:$0xff] %vm480_vm4, %v478_v26 }
  0xad   : > { %v483_v27 = vpop.permute.xlu0 %482  ;;  %v488_v28 = vpop.permute.xlu1 %487 }
  0xae   : > { %486 = vst.msk [vmem:[#allocation3] sm:$0xff] %vm485_vm5, %v483_v27 }
  0xaf   : > { %491 = vst.msk [vmem:[#allocation3] sm:$0xff] %vm490_vm6, %v488_v28 }
  0xb1   : > { %v493_v29 = vpop.permute.xlu0 %492  ;;  %v523_v30 = vpop.permute.xlu1 %522 }
  0xb2   : > { %496 = vst.msk [vmem:[#allocation3] sm:$0xff] %vm495_vm7, %v493_v29 }
  0xb5   : > { %v527_v31 = vpop.permute.xlu0 %526  ;;  %v531_v32 = vpop.permute.xlu1 %530 }
  0xb9   : > { %v497_v33 = vld [vmem:[#allocation3] sm:$0xff]  ;;  %v535_v34 = vpop.permute.xlu0 %534  ;;  %v539_v35 = vpop.permute.xlu1 %538 }
  0xba   : > { %525 = vst.msk [vmem:[#allocation3] sm:$0xff] %vm465_vm1, %v523_v30  ;;  %502 = vrot.lane.b32.xlu1 %v497_v33, %s1044_s14  ;;  %v672_v30 = vld [vmem:[%s1147_s6 + $0x8] sm:$0xff] }
  0xbb   : > { %499 = vst.msk [vmem:[#allocation4] sm:$0xff] %vm498_vm8, %v497_v33 }
  0xbc   : > { %529 = vst.msk [vmem:[#allocation3] sm:$0xff] %vm470_vm2, %v527_v31 }
  0xbd   : > { %533 = vst.msk [vmem:[#allocation3] sm:$0xff] %vm475_vm3, %v531_v32  ;;  %v543_v36 = vpop.permute.xlu0 %542  ;;  %v547_v37 = vpop.permute.xlu1 %546 }
  0xbe   : > { %537 = vst.msk [vmem:[#allocation3] sm:$0xff] %vm480_vm4, %v535_v34  ;;  %508 = vrot.lane.b32.xlu1 %v497_v33, %s1046_s16 }
  0xbf   : > { %541 = vst.msk [vmem:[#allocation3] sm:$0xff] %vm485_vm5, %v539_v35 }
  0xc0   : > { %545 = vst.msk [vmem:[#allocation3] sm:$0xff] %vm490_vm6, %v543_v36 }
  0xc1   : > { %549 = vst.msk [vmem:[#allocation3] sm:$0xff] %vm495_vm7, %v547_v37 }
  0xc2   : > { %578 = vperm.xlu1 %1007, %v574_v40  }
  0xc8   : > { %v550_v39 = vld [vmem:[#allocation3] sm:$0xff] }
  0xc9   : > { %552 = vrot.lane.b32.xlu0 %v550_v39, %s1048_s23 }
  0xcd   : > { %559 = vrot.lane.b32.xlu0 %v550_v39, %s1049_s20 }
  0xd1   : > { %565 = vrot.lane.b32.xlu0 %v550_v39, %s1052_s27 }
  0xd5   : > { %583 = vperm.xlu0 %1008, %v575_v42  }
 0x12c   : > { %v503_v43 = vpop.permute.xlu1 %502 }
 0x12d   : > { %505 = vst.msk [vmem:[#allocation4 + $0x8] sm:$0xff] %vm498_vm8, %v503_v43 }
 0x130   : > { %v509_v44 = vpop.permute.xlu1 %508 }
 0x131   : > { %511 = vst.msk [vmem:[#allocation4 + $0x10] sm:$0xff] %vm498_vm8, %v509_v44 }
 0x13b   : > { %v553_v45 = vpop.permute.xlu0 %552 }
 0x13c   : > { %556 = vst.msk [vmem:[#allocation4] sm:$0xff] %vm555_vm10, %v553_v45 }
 0x13f   : > { %v560_v46 = vpop.permute.xlu0 %559 }
 0x140   : > { %562 = vst.msk [vmem:[#allocation4 + $0x8] sm:$0xff] %vm555_vm10, %v560_v46 }
 0x141   : > { %v579_v52 = vpop.permute.xlu1 %578 }
 0x143   : > { %v566_v47 = vpop.permute.xlu0 %565  ;;  %v571_v48 = vld [vmem:[#allocation4] sm:$0xff] }
 0x144   : > { %568 = vst.msk [vmem:[#allocation4 + $0x10] sm:$0xff] %vm555_vm10, %v566_v47  ;;  %958 = vmatpush3.bf16.msra.mxu0 %v571_v48 }
 0x145   : > { %959 = vmatprep.subr.bf16.mxu0 %v1047_v38 }
 0x147   : > { %v572_v49 = vld [vmem:[#allocation4 + $0x8] sm:$0xff] }
 0x148   : > { %960 = vmatpush3.bf16.msra.mxu0 %v572_v49 }
 0x149   : > { %961 = vmatprep.subr.bf16.mxu0 %v1047_v38 }
 0x14b   : > { %v573_v50 = vld [vmem:[#allocation4 + $0x10] sm:$0xff] }
 0x14c   : > { %962 = vmatpush3.bf16.msra.mxu0 %v573_v50 }
 0x14f   : > { %964 = vmatmul.mubr.msk.bf16.vlgmr.msra.gmra.mrb[0].mxu0 %vm591_vm11, %v1009_v51 }
 0x154   : > { %v584_v54 = vpop.permute.xlu0 %583 }
 0x222   : > { %v629_v53 = vpop.f32.mrb[0].mxu0 }
 0x223   : > { %v630_v55 = vadd.f32 %v629_v53, %v579_v52  ;;  %v965_v56 = vpop.f32.mrb[1].mxu0 }
 0x224   : > { %v632_v57 = vpop.f32.mrb[2].mxu0 }
 0x225   : > { %v636_v58 = vmax.f32 %v630_v55, 0.0  ;;  %v633_v59 = vadd.f32 %v632_v57, %v584_v54  ;;  %v966_v60 = vpop.f32.mrb[3].mxu0 }
 0x227   : > { %v637_v61 = vmax.f32 %v633_v59, 0.0  ;;  %v639_v62 = vsel %vm638_vm12, %v636_v58, 0.0  ;;  %v645_v63 = vmul.f32 %v636_v58, %v636_v58 }
 0x228   : > { %640 = vadd.xlane.f32.xlu1 %v639_v62 }
 0x229   : > { %v642_v0 = vsel %vm638_vm12, %v637_v61, 0.0  ;;  %v646_v1 = vmul.f32 %v637_v61, %v637_v61  ;;  %v647_v2 = vsel %vm638_vm12, %v645_v63, 0.0 }
 0x22a   : > { %643 = vadd.xlane.f32.xlu0 %v642_v0 }
 0x22b   : > { %v650_v3 = vsel %vm638_vm12, %v646_v1, 0.0 }
 0x22c   : > { %648 = vadd.xlane.f32.xlu1 %v647_v2 }
 0x22e   : > { %651 = vadd.xlane.f32.xlu0 %v650_v3 }
 0x2b5   : > { %v641_v4 = vpop.xlane.xlu1 %640 }
 0x2b6   : > { %v653_v5 = vmul.f32 0.03125, %v641_v4 }
 0x2b7   : > { %v644_v6 = vpop.xlane.xlu0 %643 }
 0x2b8   : > { %v654_v7 = vmul.f32 0.03125, %v644_v6  ;;  %v657_v9 = vmul.f32 %v653_v5, %v653_v5 }
 0x2b9   : > { %v649_v8 = vpop.xlane.xlu1 %648 }
 0x2ba   : > { %v655_v10 = vmul.f32 0.03125, %v649_v8  ;;  %v658_v12 = vmul.f32 %v654_v7, %v654_v7 }
 0x2bb   : > { %v652_v11 = vpop.xlane.xlu0 %651 }
 0x2bc   : > { %v659_v13 = vsub.f32 %v655_v10, %v657_v9  ;;  %v656_v14 = vmul.f32 0.03125, %v652_v11 }
 0x2be   : > { %v661_v15 = vmax.f32 %v659_v13, 0.0  ;;  %v660_v16 = vsub.f32 %v656_v14, %v658_v12 }
 0x2c0   : > { %v663_v17 = vadd.f32 1e-05, %v661_v15  ;;  %v662_v18 = vmax.f32 %v660_v16, 0.0 }
 0x2c2   : > { %1010 = vrsqrt.f32 %v663_v17  ;;  %v664_v19 = vadd.f32 1e-05, %v662_v18 }
 0x2c4   : > { %1012 = vrsqrt.f32 %v664_v19 }
 0x2cc   : > { %v1011_v21 = vpop.eup %1010 }
 0x2cd   : > { %v669_v23 = vmul.f32 %v1011_v21, %v667_v20 }
 0x2ce   : > { %v1013_v24 = vpop.eup %1012 }
 0x2cf   : > { %679 = vperm.xlu1 %1007, %v669_v23   ;;  %v670_v26 = vmul.f32 %v1013_v24, %v668_v22  ;;  %v673_v27 = vmul.f32 %v669_v23, %v653_v5 }
 0x2d1   : > { %684 = vperm.xlu0 %1008, %v670_v26   ;;  %v675_v28 = vsub.f32 %v671_v25, %v673_v27  ;;  %v674_v29 = vmul.f32 %v670_v26, %v654_v7 }
 0x2d3   : > { %691 = vperm.xlu1 %1007, %v675_v28   ;;  %v676_v31 = vsub.f32 %v672_v30, %v674_v29 }
 0x2d7   : > { %696 = vperm.xlu1 %1007, %v676_v31  }
 0x34e   : > { %v680_v32 = vpop.permute.xlu1 %679 }
 0x34f   : > { %v687_v33 = vmul.f32 %v680_v32, %v636_v58 }
 0x350   : > { %v685_v34 = vpop.permute.xlu0 %684 }
 0x351   : > { %v688_v37 = vmul.f32 %v685_v34, %v637_v61 }
 0x352   : > { %v692_v35 = vpop.permute.xlu1 %691 }
 0x353   : > { %v699_v36 = vadd.f32 %v692_v35, %v687_v33 }
 0x355   : > { %701 = vst.msk [vmem:[%s1151_s8] sm:$0xff] %vm498_vm8, %v699_v36  ;;  %703 = vst.msk [vmem:[#allocation2] sm:$0xff] %vm498_vm8, %v699_v36  ;;  %707 = vrot.lane.b32.xlu0 %v699_v36, %s1053_s17 }
 0x356   : > { %v697_v38 = vpop.permute.xlu1 %696 }
 0x357   : > { %v700_v39 = vadd.f32 %v697_v38, %v688_v37 }
 0x359   : > { %702 = vst.msk [vmem:[%s1151_s8 + $0x8] sm:$0xff] %vm498_vm8, %v700_v39  ;;  %704 = vst.msk [vmem:[#allocation2 + $0x8] sm:$0xff] %vm498_vm8, %v700_v39  ;;  %709 = vrot.lane.b32.xlu1 %v700_v39, %s1053_s17 }
 0x3c7   : > { %v708_v40 = vpop.permute.xlu0 %707 }
 0x3c8   : > { %932 = vst.msk [vmem:[%s1151_s8 + $0x10] sm:$0xff] %vm498_vm8, %v708_v40  ;;  %716 = vst.msk [vmem:[#allocation2 + $0x10] sm:$0xff] %vm498_vm8, %v708_v40 }
 0x3cb   : > { %v710_v41 = vpop.permute.xlu1 %709 }
 0x3cc   : > { %933 = vst.msk [vmem:[%s1151_s8 + $0x18] sm:$0xff] %vm498_vm8, %v710_v41  ;;  %717 = vst.msk [vmem:[#allocation2 + $0x18] sm:$0xff] %vm498_vm8, %v710_v41 }
 0x3cd PF: > { %724 = sbr.rel (!%p1115_p5) target bundleno = 981 (0x3d5), region = 90  ;;  %s952_s24 = sshll.u32 (%p1115_p5), %s1100_s21, 4  ;;  %v761_v42 = vld [vmem:[%s1151_s8] sm:$0xff] (%p1115_p5)  ;;  %v763_v43 = vld [vmem:[%s1151_s8 + $0x8] sm:$0xff] (%p1115_p5) }
 0x3ce   : > { %s727_s29 = scalar_lea.vmem (%p1115_p5), %s1231_s5, %s952_s24 }
 0x3cf   : > { %v765_v44 = vld [vmem:[%s1151_s8 + $0x10] sm:$0xff] (%p1115_p5)  ;;  %762 = vst [vmem:[%s727_s29] sm:$0xff] (%p1115_p5), %v761_v42  ;;  %764 = vst [vmem:[%s727_s29 + $0x8] sm:$0xff] (%p1115_p5), %v763_v43 }
 0x3d0   : > { %766 = vst [vmem:[%s727_s29 + $0x40] sm:$0xff] (%p1115_p5), %v765_v44 }
 0x3d3   : > { %v767_v45 = vld [vmem:[%s1151_s8 + $0x18] sm:$0xff] (%p1115_p5) }
 0x3d4   : > { %768 = vst [vmem:[%s727_s29 + $0x48] sm:$0xff] %v767_v45 }
 0x3d5 PF: > { %p12_p0 = scmp.ge.s32.totalorder %s1103_s22, 6   ;;  %s1233_s18 = smov %s1032_s19 }
 0x3d6   : > { %s1234_s19 = smov %s1113_s25  ;;  %s1235_s20 = smov %s1103_s22 }
 0x3d7   :  { %14 = sbr.rel (!%p12_p0) target bundleno = 2 (0x2), region = 174 }

</bundles_post_ra>
